<compile_context>
chip_gen: v7x
topology: tpu7x:2x2x1
jax: 0.10.0
libtpu: 0.0.40
codegen_flags: <defaults>
</compile_context>

<pallas_src>
import functools

import jax
import jax.numpy as jnp
from jax.experimental import pallas as pl
from jax.experimental.pallas import tpu as pltpu

IN_FEATURES = 8
OUT_FEATURES = 6
NEGATIVE_SLOPE = 0.01


def _linear_leaky_kernel(x_ref, w_ref, o_ref, *, negative_slope):
    # x: (B, IN+1) -- trailing column is constant 1.0 (bias lane).
    # w: (IN+1, OUT) -- pre-transposed PyTorch weight with bias as last row.
    y = jnp.dot(x_ref[...], w_ref[...], preferred_element_type=jnp.float32)
    # leaky_relu: max(y, slope*y) == where(y > 0, y, slope*y) for 0 < slope < 1.
    o_ref[...] = jnp.maximum(y, y * negative_slope).astype(o_ref.dtype)


def model_forward(x, weight, bias, negative_slope=NEGATIVE_SLOPE):
    """x: (B, IN) f32, weight: (OUT, IN) f32 (PyTorch layout), bias: (OUT,) f32."""
    batch, in_f = x.shape
    out_f = weight.shape[0]

    # Fold bias into the matmul (one fewer kernel operand / DMA):
    #   w_aug = [ W^T ; b ]  -> (IN+1, OUT);   x_aug = [ x | 1 ] -> (B, IN+1)
    w_aug = jnp.concatenate([weight.T, bias.reshape(1, out_f)], axis=0)
    x_aug = jnp.concatenate([x, jnp.ones((batch, 1), dtype=x.dtype)], axis=1)

    kernel = functools.partial(_linear_leaky_kernel, negative_slope=negative_slope)

    cost = pl.CostEstimate(
        flops=2 * batch * (in_f + 1) * out_f,
        bytes_accessed=4 * (batch * (in_f + 1) + (in_f + 1) * out_f + batch * out_f),
        transcendentals=0,
    )

    # No grid: single full-block invocation, all operands resident in VMEM.
    return pl.pallas_call(
        kernel,
        out_shape=jax.ShapeDtypeStruct((batch, out_f), x.dtype),
        in_specs=[
            pl.BlockSpec(memory_space=pltpu.MemorySpace.VMEM),  # x_aug (B, IN+1)
            pl.BlockSpec(memory_space=pltpu.MemorySpace.VMEM),  # w_aug (IN+1, OUT)
        ],
        out_specs=pl.BlockSpec(memory_space=pltpu.MemorySpace.VMEM),
        cost_estimate=cost,
    )(x_aug, w_aug)


def _reference(x, weight, bias, negative_slope=NEGATIVE_SLOPE):
    v1 = x @ weight.T + bias
    return jnp.where(v1 > 0, v1, v1 * negative_slope)


if __name__ == "__main__":
    key = jax.random.PRNGKey(0)
    kx, kw, kb = jax.random.split(key, 3)

    # Input matching the module's implied shape: (1, 8)
    x1 = jax.random.normal(kx, (1, IN_FEATURES), dtype=jnp.float32)

    # Deterministic Linear(8, 6) parameters (PyTorch-style uniform init bounds).
    bound = 1.0 / (IN_FEATURES ** 0.5)
    weight = jax.random.uniform(
        kw, (OUT_FEATURES, IN_FEATURES), minval=-bound, maxval=bound,
        dtype=jnp.float32)
    bias = jax.random.uniform(
        kb, (OUT_FEATURES,), minval=-bound, maxval=bound, dtype=jnp.float32)

    out = model_forward(x1, weight, bias)
    out = jax.block_until_ready(out)

    ref = _reference(x1, weight, bias)
    assert out.shape == (1, OUT_FEATURES), out.shape
    assert jnp.allclose(out, ref, atol=1e-5, rtol=1e-5), (out, ref)

    print("KERNEL_OK")
</pallas_src>

<mosaic_0001>
module attributes {stable_mosaic.version = 11 : i64} {
  func.func @_linear_leaky_kernel(%arg0: memref<1x9xf32, #tpu.memory_space<vmem>>, %arg1: memref<9x6xf32, #tpu.memory_space<vmem>>, %arg2: memref<1x6xf32, #tpu.memory_space<vmem>>) attributes {dimension_semantics = [], scalar_prefetch = 0 : i64, scratch_operands = 0 : i64, tpu.core_type = #tpu.core_type<tc>} {
    %c0 = arith.constant 0 : index
    %c0_0 = arith.constant 0 : index
    %0 = vector.load %arg0[%c0, %c0_0] : memref<1x9xf32, #tpu.memory_space<vmem>>, vector<1x9xf32>
    %c0_1 = arith.constant 0 : index
    %c0_2 = arith.constant 0 : index
    %1 = vector.load %arg1[%c0_1, %c0_2] : memref<9x6xf32, #tpu.memory_space<vmem>>, vector<9x6xf32>
    %cst = arith.constant dense<0.000000e+00> : vector<1x6xf32>
    %2 = tpu.matmul %0, %1, %cst {dimension_numbers = #tpu.dot_dimension_numbers<[1], [0], [0], [1], [0, 0, 1, 1], [], []>} : vector<1x9xf32>, vector<9x6xf32>, vector<1x6xf32> -> vector<1x6xf32>
    %cst_3 = arith.constant 0.00999999977 : f32
    %3 = vector.broadcast %cst_3 : f32 to vector<1x6xf32>
    %4 = arith.mulf %2, %3 : vector<1x6xf32>
    %5 = arith.maximumf %2, %4 : vector<1x6xf32>
    %c0_4 = arith.constant 0 : index
    %c0_5 = arith.constant 0 : index
    %6 = vector.load %arg2[%c0_4, %c0_5] : memref<1x6xf32, #tpu.memory_space<vmem>>, vector<1x6xf32>
    tpu.vector_store %arg2[%c0_4, %c0_5], %5 {strides = array<i32>} : memref<1x6xf32, #tpu.memory_space<vmem>>, vector<1x6xf32>,
    return
  }
}

</mosaic_0001>

<bundles_post_ra>
// kernel: tpu_custom_call.1
= control target key start
LH: loop header
LB: loop body
LE: loop exit
PB: predicated region body
PF: predicated region fallthrough
CT: control target
= control target key end

     0   :  { %vm19_vm0 = vcmask 1040384   ;;  %v156_v2 = vmov 0.0|0.0   ;;  %vm157_vm1 = vmmov 1   ;;  %vm158_vm3 = vmmov 0   ;;  %s197_s0 = inlined_call_operand.vmem [shape: f32[1,9], index: 0, kind: input, shape index: {}]   ;;  %s198_s1 = inlined_call_operand.vmem [shape: f32[9,6], index: 1, kind: input, shape index: {}]   ;;  %s199_s2 = inlined_call_operand.hbm [shape: f32[1,6], index: 2, kind: output, shape index: {}]  }
   0x1   :  { %v13_v0 = vld [vmem:[%s198_s1] sm:$0xff]  ;;  %v14_v1 = vld [vmem:[%s198_s1 + $0x8] sm:$0x1]  ;;  %123 = vmatprep.subr.bf16.mxu0 %v156_v2  ;;  %vm125_vm2 = vmpackc.low %vm19_vm0, %vm157_vm1  ;;  %v159_v4 = vmov 0.0  }
   0x2   :  { %v124_v3 = vpack.c.bf16 %v14_v1, %v13_v0  ;;  %120 = vmatprep.mubr.msk.f32.mxu0 %vm158_vm3, %v159_v4 }
   0x3   :  { %7 = vsyncpa [#allocation3], 0  ;;  %v12_v5 = vld [vmem:[%s197_s0] sm:$0x1]  ;;  %vm15_vm4 = vcmask 72704   ;;  %s160_s15 = smov [#allocation2]  }
   0x4   :  { %126 = vmatpush3.bf16.msk.msra.mxu0 %vm125_vm2, %v124_v3  ;;  %s103_s1 = sshll.u32 %s160_s15, 4  ;;  %vm95_vm5 = vcmask 40960   ;;  %s104_s1 = int_to_ptr.vmem [resolvable:$true] %s103_s1 }
   0x5   :  { %s132_s16 = scalar_lea.vmem %s104_s1, 16  ;;  %s136_s17 = scalar_lea.vmem %s104_s1, 32 }
   0x6   :  { %p133_p0 = scmp.ne.s32.totalorder %s104_s1, %s132_s16  ;;  %p137_p1 = scmp.lt.s32.totalorder %s104_s1, %s104_s1 }
   0x7   :  { %121 = vmatmul.mubr.msk.f32.vlgmr.msra.gmra.mrb[0].mxu0 %vm15_vm4, %v12_v5  ;;  %p138_p2 = scmp.lt.s32.totalorder %s136_s17, %s132_s16 }
   0x9   :  { %p139_p3 = por %p138_p2, %p137_p1 }
   0xb   :  { %p140_p4 = pnand %p139_p3, %p133_p0 }
  0xda   :  { %v89_v6 = vpop.f32.mrb[0].mxu0 }
  0xdb   :  { %v93_v7 = vmul.f32 0.01, %v89_v6  ;;  %v122_v8 = vpop.f32.mrb[1].mxu0 }
  0xdd   :  { %v94_v9 = vmax.f32 %v89_v6, %v93_v7 }
  0xdf   :  { %96 = vst.msk [vmem:[#allocation2] sm:$0x1] %vm95_vm5, %v94_v9 }
  0xe0   :  { %143 = shalt.err (!%p140_p4)
}
  0xe1   :  { %s144_s19 = scalar_lea.hbm %s199_s2, 16 }
  0xe2   :  { %p145_p5 = scmp.ne.s32.totalorder %s199_s2, %s144_s19  ;;  %p148_p6 = scmp.lt.u32.totalorder %s144_s19, %s199_s2 }
  0xe4   :  { %p150_p7 = pnand %p148_p6, %p145_p5 }
  0xe6   :  { %153 = shalt.err (!%p150_p7)
}
  0xe7   :  { %106 = dma.vmem_to_hbm [thread:$0]  %s104_s1, 16, %s199_s2, [#allocation3]  }
  0xe8   :  { %154 = dma.done.wait [#allocation3], 16  }
  0xe9   :  { %155 = vsyncadd [#allocation3], 4294967280 }
  0xea   :  { %110 = vsyncpa [#allocation3], 1 }

</bundles_post_ra>
